<compile_context>
chip_gen: v7x
topology: tpu7x:2x2x1
jax: 0.10.0
libtpu: 0.0.40
codegen_flags: <defaults>
</compile_context>

<pallas_src>
import functools
import math

import jax
import jax.numpy as jnp
import numpy as np
from jax.experimental import pallas as pl
from jax.experimental.pallas import tpu as pltpu

_VMEM_LIMIT = 48 * 1024 * 1024  # < v7x 64 MiB physical; fine on v5e/v6e


def _softplus(x):
    # Matches F.softplus(x, beta=1, threshold=20): linear above the threshold.
    return jnp.where(x > 20.0, x, jnp.log1p(jnp.exp(jnp.minimum(x, 20.0))))


def _round_up(x, m):
    return (x + m - 1) // m * m


# ---------------------------------------------------------------------------
# Kernel 1: weight prep.  grid = (n_in tiles, n_out tiles).  Each weight element is
# read once; emits W_mu cast to compute_dtype, std_w^2 in compute_dtype, and the
# per-tile closed-form KL partial sums (f32, SMEM).
# ---------------------------------------------------------------------------
def _prep_weights_kernel(wmu_ref, wp_ref, wmu_c_ref, swsq_ref, kl_ref, *,
                         log_sig2, inv_sig2):
    w_mu = wmu_ref[...]
    std_w = 1e-6 + _softplus(wp_ref[...])
    swsq = std_w * std_w
    wmu_c_ref[...] = w_mu.astype(wmu_c_ref.dtype)
    swsq_ref[...] = swsq.astype(swsq_ref.dtype)
    # 0.5 * sum( 2*log(sig_p/std) - 1 + (std/sig_p)^2 + (mu/sig_p)^2 )
    kl_tile = 0.5 * jnp.sum(
        log_sig2 - jnp.log(swsq) - 1.0 + (swsq + w_mu * w_mu) * inv_sig2)
    kl_ref[pl.program_id(0) * pl.num_programs(1) + pl.program_id(1)] = kl_tile


# ---------------------------------------------------------------------------
# Kernel 2: sampled forward pass, (batch, n_out, n_in) grid, two f32 K-accumulators.
# Init on k == 0; finalize (sqrt, eps multiply, bias add, lane-dense store) on the
# last K step.  Weight tiles arrive already in compute_dtype (no per-step casts).
# ---------------------------------------------------------------------------
def _fwd_sample_kernel(x_ref, wmu_ref, swsq_ref, epsw_ref, brow_ref, out_ref,
                       acc_mu, acc_var, *, compute_dtype):
    k = pl.program_id(2)

    @pl.when(k == 0)
    def _():
        acc_mu[...] = jnp.zeros_like(acc_mu)
        acc_var[...] = jnp.zeros_like(acc_var)

    x = x_ref[...]                              # f32; square on the VPU in f32
    acc_mu[...] += jnp.dot(x.astype(compute_dtype), wmu_ref[...],
                           preferred_element_type=jnp.float32)
    acc_var[...] += jnp.dot((x * x).astype(compute_dtype), swsq_ref[...],
                            preferred_element_type=jnp.float32)

    @pl.when(k == pl.num_programs(2) - 1)
    def _():
        out = acc_mu[...] + jnp.sqrt(acc_var[...]) * epsw_ref[...] + brow_ref[...]
        out_ref[...] = out.astype(out_ref.dtype)


# ---------------------------------------------------------------------------
# Kernel 3: deterministic (eval) forward pass, same tiled skeleton
# ---------------------------------------------------------------------------
def _fwd_eval_kernel(x_ref, wmu_ref, brow_ref, out_ref, acc_mu, *, compute_dtype):
    k = pl.program_id(2)

    @pl.when(k == 0)
    def _():
        acc_mu[...] = jnp.zeros_like(acc_mu)

    acc_mu[...] += jnp.dot(x_ref[...].astype(compute_dtype), wmu_ref[...],
                           preferred_element_type=jnp.float32)

    @pl.when(k == pl.num_programs(2) - 1)
    def _():
        out_ref[...] = (acc_mu[...] + brow_ref[...]).astype(out_ref.dtype)


# ---------------------------------------------------------------------------
# Module-equivalent wrapper
# ---------------------------------------------------------------------------
class BayesLinearLocalReparam:
    """JAX/Pallas equivalent of BayesLinear_local_reparam (forward + closed-form KL)."""

    def __init__(self, n_in, n_out, prior_sig, key, *,
                 compute_dtype=jnp.bfloat16, out_dtype=jnp.float32,
                 block_m=None, block_n=None, block_k=None):
        self.n_in = int(n_in)
        self.n_out = int(n_out)
        self.prior_sig = float(prior_sig)          # assumed > 1e-6
        self.compute_dtype = compute_dtype
        self.out_dtype = out_dtype
        self.block_m, self.block_n, self.block_k = block_m, block_n, block_k

        k1, k2, k3, k4 = jax.random.split(key, 4)
        self.W_mu = jax.random.uniform(k1, (n_in, n_out), jnp.float32, -0.1, 0.1)
        self.W_p = jax.random.uniform(k2, (n_in, n_out), jnp.float32, -3.0, -2.0)
        self.b_mu = jax.random.uniform(k3, (n_out,), jnp.float32, -0.1, 0.1)
        self.b_p = jax.random.uniform(k4, (n_out,), jnp.float32, -3.0, -2.0)

        # W_p padding value with exactly-zero KL contribution:
        # softplus(p*) + 1e-6 == prior_sig  =>  per-element KL(mu=0, std=prior_sig) == 0.
        self._wp_pad = float(math.log(math.expm1(self.prior_sig - 1e-6)))

        # Bias std / bias KL (tiny, n_out elements) once in plain JAX.
        # NOTE: the PyTorch reference hard-codes sig_p = 0.1 for the bias prior.
        std_b = 1e-6 + jax.nn.softplus(self.b_p)
        self._std_b = std_b
        self._kld_b = 0.5 * jnp.sum(2.0 * jnp.log(0.1 / std_b) - 1.0
                                    + (std_b / 0.1) ** 2 + (self.b_mu / 0.1) ** 2)

        # Cache of prepped (padded + cast) weights, keyed by (tk, tn).
        # TODO(synk): invalidate this cache if W_mu / W_p are updated by a training step.
        self._prep_cache = {}

    # ---------------- tiling helpers ----------------
    def _tiles(self, batch):
        tm = self.block_m or min(512, _round_up(batch, 8))
        tn = self.block_n or min(512, _round_up(self.n_out, 128))
        tk = self.block_k or min(1024, _round_up(self.n_in, 128))
        assert tm % 8 == 0 and tn % 128 == 0 and tk % 128 == 0
        return tm, tn, tk

    # ---------------- prep kernel launch (cached) ----------------
    def _prep_weights(self, wmu_p, wp_p, tk, tn):
        kp_, np_ = wmu_p.shape
        nkw, njw = kp_ // tk, np_ // tn
        kernel = functools.partial(
            _prep_weights_kernel,
            log_sig2=float(2.0 * math.log(self.prior_sig)),
            inv_sig2=float(1.0 / (self.prior_sig * self.prior_sig)))
        return pl.pallas_call(
            kernel,
            out_shape=(jax.ShapeDtypeStruct((kp_, np_), self.compute_dtype),
                       jax.ShapeDtypeStruct((kp_, np_), self.compute_dtype),
                       jax.ShapeDtypeStruct((nkw * njw,), jnp.float32)),
            grid_spec=pltpu.PrefetchScalarGridSpec(
                num_scalar_prefetch=0,
                grid=(nkw, njw),
                in_specs=[pl.BlockSpec((tk, tn), lambda k, j: (k, j)),
                          pl.BlockSpec((tk, tn), lambda k, j: (k, j))],
                out_specs=(pl.BlockSpec((tk, tn), lambda k, j: (k, j)),
                           pl.BlockSpec((tk, tn), lambda k, j: (k, j)),
                           pl.BlockSpec(memory_space=pltpu.MemorySpace.SMEM))),
            compiler_params=pltpu.CompilerParams(
                dimension_semantics=("arbitrary", "arbitrary"),
                vmem_limit_bytes=_VMEM_LIMIT),
        )(wmu_p, wp_p)

    def _get_prepped(self, tk, tn, Kp, Np):
        key = (tk, tn)
        if key not in self._prep_cache:
            Wmu_p = jnp.pad(self.W_mu, ((0, Kp - self.n_in), (0, Np - self.n_out)))
            Wp_p = jnp.pad(self.W_p, ((0, Kp - self.n_in), (0, Np - self.n_out)),
                           constant_values=self._wp_pad)
            wmu_c_p, swsq_p, kl_parts = self._prep_weights(Wmu_p, Wp_p, tk, tn)
            self._prep_cache[key] = (wmu_c_p, swsq_p, jnp.sum(kl_parts))
        return self._prep_cache[key]

    # ---------------- forward kernel launches ----------------
    def _forward_sample(self, xp, wmu_c_p, swsq_p, epsw_p, brow, tm, tn, tk):
        bp_, kp_ = xp.shape
        np_ = wmu_c_p.shape[1]
        grid = (bp_ // tm, np_ // tn, kp_ // tk)

        x_spec = pl.BlockSpec((tm, tk), lambda i, j, k: (i, k))
        w_spec = pl.BlockSpec((tk, tn), lambda i, j, k: (k, j))
        e_spec = pl.BlockSpec((tm, tn), lambda i, j, k: (i, j))
        b_spec = pl.BlockSpec((1, tn), lambda i, j, k: (0, j))
        o_spec = pl.BlockSpec((tm, tn), lambda i, j, k: (i, j))

        w_item = jnp.dtype(self.compute_dtype).itemsize
        o_item = jnp.dtype(self.out_dtype).itemsize
        cost = pl.CostEstimate(
            flops=int(4 * bp_ * kp_ * np_),
            transcendentals=int(bp_ * np_),               # sqrt in the finalize step
            bytes_accessed=int(xp.size * 4
                               + (bp_ // tm) * (wmu_c_p.size + swsq_p.size) * w_item
                               + epsw_p.size * 4 + brow.size * 4
                               + bp_ * np_ * o_item))

        kernel = functools.partial(_fwd_sample_kernel,
                                   compute_dtype=self.compute_dtype)
        return pl.pallas_call(
            kernel,
            out_shape=jax.ShapeDtypeStruct((bp_, np_), self.out_dtype),
            grid_spec=pltpu.PrefetchScalarGridSpec(
                num_scalar_prefetch=0,
                grid=grid,
                in_specs=[x_spec, w_spec, w_spec, e_spec, b_spec],
                out_specs=o_spec,
                scratch_shapes=[pltpu.VMEM((tm, tn), jnp.float32),
                                pltpu.VMEM((tm, tn), jnp.float32)]),
            compiler_params=pltpu.CompilerParams(
                dimension_semantics=("parallel", "parallel", "arbitrary"),
                vmem_limit_bytes=_VMEM_LIMIT),
            cost_estimate=cost,
        )(xp, wmu_c_p, swsq_p, epsw_p, brow)

    def _forward_eval(self, xp, wmu_c_p, brow, tm, tn, tk):
        bp_, kp_ = xp.shape
        np_ = wmu_c_p.shape[1]
        grid = (bp_ // tm, np_ // tn, kp_ // tk)
        kernel = functools.partial(_fwd_eval_kernel, compute_dtype=self.compute_dtype)
        return pl.pallas_call(
            kernel,
            out_shape=jax.ShapeDtypeStruct((bp_, np_), self.out_dtype),
            grid_spec=pltpu.PrefetchScalarGridSpec(
                num_scalar_prefetch=0,
                grid=grid,
                in_specs=[pl.BlockSpec((tm, tk), lambda i, j, k: (i, k)),
                          pl.BlockSpec((tk, tn), lambda i, j, k: (k, j)),
                          pl.BlockSpec((1, tn), lambda i, j, k: (0, j))],
                out_specs=pl.BlockSpec((tm, tn), lambda i, j, k: (i, j)),
                scratch_shapes=[pltpu.VMEM((tm, tn), jnp.float32)]),
            compiler_params=pltpu.CompilerParams(
                dimension_semantics=("parallel", "parallel", "arbitrary"),
                vmem_limit_bytes=_VMEM_LIMIT),
        )(xp, wmu_c_p, brow)

    # ---------------- public forward ----------------
    def __call__(self, X, *, sample=True, training=True, eps=None, eps_key=None,
                 rng_seed=0):
        B = X.shape[0]
        tm, tn, tk = self._tiles(B)
        Bp = _round_up(B, tm)
        Kp = _round_up(self.n_in, tk)
        Np = _round_up(self.n_out, tn)

        Xp = jnp.pad(X.astype(jnp.float32), ((0, Bp - B), (0, Kp - self.n_in)))
        wmu_c_p, swsq_p, kld_w = self._get_prepped(tk, tn, Kp, Np)

        if (not training) and (not sample):
            brow = jnp.pad(self.b_mu[None, :], ((0, 0), (0, Np - self.n_out)))
            out_p = self._forward_eval(Xp, wmu_c_p, brow, tm, tn, tk)
            return out_p[:B, :self.n_out], jnp.float32(0.0), 0

        # ----- sampled (training) path -----
        if eps is not None:
            eps_W, eps_b = eps
        else:
            if eps_key is None:
                eps_key = jax.random.PRNGKey(rng_seed)
            ke_w, ke_b = jax.random.split(eps_key)
            eps_W = jax.random.normal(ke_w, (B, self.n_out), jnp.float32)
            eps_b = jax.random.normal(ke_b, (self.n_out,), jnp.float32)

        brow = jnp.pad((self.b_mu + self._std_b * eps_b)[None, :],
                       ((0, 0), (0, Np - self.n_out)))
        epsw_p = jnp.pad(jnp.asarray(eps_W, jnp.float32),
                         ((0, Bp - B), (0, Np - self.n_out)))

        out_p = self._forward_sample(Xp, wmu_c_p, swsq_p, epsw_p, brow, tm, tn, tk)
        return out_p[:B, :self.n_out], kld_w + self._kld_b, 0


# ---------------------------------------------------------------------------
# float64 numpy reference (forward + KL) for verification
# ---------------------------------------------------------------------------
def _reference_np(W_mu, W_p, b_mu, b_p, prior_sig, X, eps_W, eps_b):
    W_mu = np.asarray(W_mu, np.float64)
    W_p = np.asarray(W_p, np.float64)
    b_mu = np.asarray(b_mu, np.float64)
    b_p = np.asarray(b_p, np.float64)
    X = np.asarray(X, np.float64)
    eps_W = np.asarray(eps_W, np.float64)
    eps_b = np.asarray(eps_b, np.float64)

    def softplus(v):
        return np.where(v > 20.0, v, np.log1p(np.exp(np.minimum(v, 20.0))))

    std_w = 1e-6 + softplus(W_p)
    std_b = 1e-6 + softplus(b_p)
    act_mu = X @ W_mu
    act_std = np.sqrt((X ** 2) @ (std_w ** 2))
    b_row = b_mu + std_b * eps_b
    out = act_mu + act_std * eps_W + b_row[None, :]
    kld_w = 0.5 * np.sum(2.0 * np.log(prior_sig / std_w) - 1.0
                         + (std_w / prior_sig) ** 2 + (W_mu / prior_sig) ** 2)
    kld_b = 0.5 * np.sum(2.0 * np.log(0.1 / std_b) - 1.0
                         + (std_b / 0.1) ** 2 + (b_mu / 0.1) ** 2)
    return out, float(kld_w + kld_b), act_mu, act_std, b_row


if __name__ == "__main__":
    key = jax.random.PRNGKey(0)
    k_param, k_x, k_eps, k_param2, k_x2, k_eps2 = jax.random.split(key, 6)

    # ---- aligned small shapes: 2x1x1 forward grid, 1x1 prep grid ----
    B, N_IN, N_OUT = 64, 128, 128
    X = jax.random.normal(k_x, (B, N_IN), jnp.float32)
    ke_w, ke_b = jax.random.split(k_eps)
    eps_W = jax.random.normal(ke_w, (B, N_OUT), jnp.float32)
    eps_b = jax.random.normal(ke_b, (N_OUT,), jnp.float32)

    # Same key -> identical parameters in both layers; one f32 MXU, one bf16 MXU.
    layer_f32 = BayesLinearLocalReparam(N_IN, N_OUT, prior_sig=0.1, key=k_param,
                                        compute_dtype=jnp.float32,
                                        block_m=32, block_n=128, block_k=128)
    layer_bf16 = BayesLinearLocalReparam(N_IN, N_OUT, prior_sig=0.1, key=k_param,
                                         block_m=32, block_n=128, block_k=128)

    ref_out, ref_kld, ref_mu, ref_std, ref_brow = _reference_np(
        layer_f32.W_mu, layer_f32.W_p, layer_f32.b_mu, layer_f32.b_p,
        layer_f32.prior_sig, X, eps_W, eps_b)

    # f32-compute sampled forward + KL
    out, kld, _ = layer_f32(X, sample=True, training=True, eps=(eps_W, eps_b))
    out = np.asarray(jax.block_until_ready(out))
    kld = float(jax.block_until_ready(kld))
    assert out.shape == (B, N_OUT)
    err = np.max(np.abs(out - ref_out))
    assert np.allclose(out, ref_out, atol=2e-2, rtol=1e-2), \
        f"forward mismatch, max abs err {err}"
    assert np.isclose(kld, ref_kld, rtol=1e-3), f"kld mismatch: {kld} vs {ref_kld}"

    # second call hits the cached prepped weights
    out_again, _, _ = layer_f32(X, sample=True, training=True, eps=(eps_W, eps_b))
    out_again = np.asarray(jax.block_until_ready(out_again))
    assert np.allclose(out_again, out, atol=1e-6)

    # deterministic eval path
    out_eval, kld_eval, _ = layer_f32(X, sample=False, training=False)
    out_eval = np.asarray(jax.block_until_ready(out_eval))
    ref_eval = (np.asarray(X, np.float64) @ np.asarray(layer_f32.W_mu, np.float64)
                + np.asarray(layer_f32.b_mu, np.float64)[None, :])
    assert np.allclose(out_eval, ref_eval, atol=2e-2, rtol=1e-2)
    assert float(kld_eval) == 0.0

    # bf16 MXU path (default compute_dtype), f32 accumulation
    out_bf, kld_bf, _ = layer_bf16(X, sample=True, training=True, eps=(eps_W, eps_b))
    out_bf = np.asarray(jax.block_until_ready(out_bf))
    assert np.allclose(out_bf, ref_out, atol=6e-2, rtol=5e-2)
    assert np.isclose(float(kld_bf), ref_kld, rtol=1e-3)

    # unaligned shapes: exercises zero-padding + KL-neutral W_p padding, non-0.1 prior
    B2, N_IN2, N_OUT2 = 8, 40, 72
    layer2 = BayesLinearLocalReparam(N_IN2, N_OUT2, prior_sig=0.15, key=k_param2)
    X2 = jax.random.normal(k_x2, (B2, N_IN2), jnp.float32)
    ke_w2, ke_b2 = jax.random.split(k_eps2)
    eps_W2 = jax.random.normal(ke_w2, (B2, N_OUT2), jnp.float32)
    eps_b2 = jax.random.normal(ke_b2, (N_OUT2,), jnp.float32)
    out2, kld2, _ = layer2(X2, sample=True, training=True, eps=(eps_W2, eps_b2))
    out2 = np.asarray(jax.block_until_ready(out2))
    ref_out2, ref_kld2, *_ = _reference_np(
        layer2.W_mu, layer2.W_p, layer2.b_mu, layer2.b_p, layer2.prior_sig,
        X2, eps_W2, eps_b2)
    assert out2.shape == (B2, N_OUT2)
    assert np.allclose(out2, ref_out2, atol=5e-2, rtol=5e-2)
    assert np.isclose(float(kld2), ref_kld2, rtol=1e-3, atol=1e-2)

    # wrapper-generated noise (eps=None): shape / finiteness sanity
    out_rng, kld_rng, _ = layer_bf16(X, sample=True, training=True, eps=None,
                                     rng_seed=7)
    out_rng = np.asarray(jax.block_until_ready(out_rng))
    assert out_rng.shape == (B, N_OUT) and np.all(np.isfinite(out_rng))
    assert np.isclose(float(kld_rng), ref_kld, rtol=1e-3)

    print("KERNEL_OK")
</pallas_src>

<mosaic_0001>
module attributes {stable_mosaic.version = 11 : i64} {
  func.func @_prep_weights_kernel(%arg0: i32, %arg1: i32, %arg2: memref<128x128xf32, #tpu.memory_space<vmem>>, %arg3: memref<128x128xf32, #tpu.memory_space<vmem>>, %arg4: memref<128x128xf32, #tpu.memory_space<vmem>>, %arg5: memref<128x128xf32, #tpu.memory_space<vmem>>, %arg6: memref<1xf32, #tpu.memory_space<smem>>) attributes {dimension_semantics = [#tpu.dimension_semantics<arbitrary>, #tpu.dimension_semantics<arbitrary>], iteration_bounds = array<i64: 1, 1>, scalar_prefetch = 0 : i64, scratch_operands = 0 : i64, tpu.core_type = #tpu.core_type<tc>, window_params = [{transform_indices = @transform_0, window_bounds = array<i64: 128, 128>}, {transform_indices = @transform_1, window_bounds = array<i64: 128, 128>}, {transform_indices = @transform_2, window_bounds = array<i64: 128, 128>}, {transform_indices = @transform_3, window_bounds = array<i64: 128, 128>}, {transform_indices = @transform_4, window_bounds = array<i64: 1>}]} {
    %c0 = arith.constant 0 : index
    %c0_0 = arith.constant 0 : index
    %0 = vector.load %arg2[%c0, %c0_0] : memref<128x128xf32, #tpu.memory_space<vmem>>, vector<128x128xf32>
    %c0_1 = arith.constant 0 : index
    %c0_2 = arith.constant 0 : index
    %1 = vector.load %arg3[%c0_1, %c0_2] : memref<128x128xf32, #tpu.memory_space<vmem>>, vector<128x128xf32>
    %cst = arith.constant 2.000000e+01 : f32
    %2 = vector.broadcast %cst : f32 to vector<128x128xf32>
    %3 = arith.cmpf ogt, %1, %2 : vector<128x128xf32>
    %cst_3 = arith.constant 2.000000e+01 : f32
    %4 = vector.broadcast %cst_3 : f32 to vector<128x128xf32>
    %5 = arith.minimumf %1, %4 : vector<128x128xf32>
    %6 = math.exp %5 : vector<128x128xf32>
    %7 = math.log1p %6 : vector<128x128xf32>
    %8 = arith.select %3, %1, %7 : vector<128x128xi1>, vector<128x128xf32>
    %cst_4 = arith.constant 9.99999997E-7 : f32
    %9 = vector.broadcast %cst_4 : f32 to vector<128x128xf32>
    %10 = arith.addf %9, %8 : vector<128x128xf32>
    %11 = arith.mulf %10, %10 : vector<128x128xf32>
    %c0_5 = arith.constant 0 : index
    %c0_6 = arith.constant 0 : index
    %12 = vector.load %arg4[%c0_5, %c0_6] : memref<128x128xf32, #tpu.memory_space<vmem>>, vector<128x128xf32>
    tpu.vector_store %arg4[%c0_5, %c0_6], %0 {strides = array<i32>} : memref<128x128xf32, #tpu.memory_space<vmem>>, vector<128x128xf32>,
    %c0_7 = arith.constant 0 : index
    %c0_8 = arith.constant 0 : index
    %13 = vector.load %arg5[%c0_7, %c0_8] : memref<128x128xf32, #tpu.memory_space<vmem>>, vector<128x128xf32>
    tpu.vector_store %arg5[%c0_7, %c0_8], %11 {strides = array<i32>} : memref<128x128xf32, #tpu.memory_space<vmem>>, vector<128x128xf32>,
    %14 = math.log %11 : vector<128x128xf32>
    %cst_9 = arith.constant -4.60517025 : f32
    %15 = vector.broadcast %cst_9 : f32 to vector<128x128xf32>
    %16 = arith.subf %15, %14 : vector<128x128xf32>
    %cst_10 = arith.constant 1.000000e+00 : f32
    %17 = vector.broadcast %cst_10 : f32 to vector<128x128xf32>
    %18 = arith.subf %16, %17 : vector<128x128xf32>
    %19 = arith.mulf %0, %0 : vector<128x128xf32>
    %20 = arith.addf %11, %19 : vector<128x128xf32>
    %cst_11 = arith.constant 1.000000e+02 : f32
    %21 = vector.broadcast %cst_11 : f32 to vector<128x128xf32>
    %22 = arith.mulf %20, %21 : vector<128x128xf32>
    %23 = arith.addf %18, %22 : vector<128x128xf32>
    %24 = vector.shape_cast %23 : vector<128x128xf32> to vector<1x128x128xf32>
    %cst_12 = arith.constant dense<0.000000e+00> : vector<1xf32>
    %25 = vector.multi_reduction <add>, %24, %cst_12 [1, 2] : vector<1x128x128xf32> to vector<1xf32>
    %26 = vector.shape_cast %25 : vector<1xf32> to vector<1x1x1xf32>
    %27 = vector.extract %26[0, 0, 0] : f32 from vector<1x1x1xf32>
    %cst_13 = arith.constant 5.000000e-01 : f32
    %28 = arith.mulf %cst_13, %27 : f32
    %c1_i32 = arith.constant 1 : i32
    %29 = arith.muli %arg0, %c1_i32 : i32
    %30 = arith.addi %29, %arg1 : i32
    %31 = arith.index_cast %30 : i32 to index
    %32 = memref.load %arg6[%31] : memref<1xf32, #tpu.memory_space<smem>>
    memref.store %28, %arg6[%31] : memref<1xf32, #tpu.memory_space<smem>>
    return
  }
  func.func @transform_0(%arg0: i32, %arg1: i32) -> (i32, i32) {
    %c0_i32 = arith.constant 0 : i32
    return %arg0, %arg1 : i32, i32
  }
  func.func @transform_1(%arg0: i32, %arg1: i32) -> (i32, i32) {
    %c0_i32 = arith.constant 0 : i32
    return %arg0, %arg1 : i32, i32
  }
  func.func @transform_2(%arg0: i32, %arg1: i32) -> (i32, i32) {
    %c0_i32 = arith.constant 0 : i32
    return %arg0, %arg1 : i32, i32
  }
  func.func @transform_3(%arg0: i32, %arg1: i32) -> (i32, i32) {
    %c0_i32 = arith.constant 0 : i32
    return %arg0, %arg1 : i32, i32
  }
  func.func @transform_4(%arg0: i32, %arg1: i32) -> i32 {
    %c0_i32 = arith.constant 0 : i32
    %c0_i32_0 = arith.constant 0 : i32
    return %c0_i32 : i32
  }
}

</mosaic_0001>

<bundles_post_ra>
// kernel: tpu_custom_call.1
= control target key start
LH: loop header
LB: loop body
LE: loop exit
PB: predicated region body
PF: predicated region fallthrough
CT: control target
= control target key end

     0   :  { %10 = vsyncpa [#allocation3], 0  ;;  %s1404_s0 = inlined_call_operand.hbm [shape: f32[128,128], index: 0, kind: input, shape index: {}]   ;;  %s1405_s1 = inlined_call_operand.hbm [shape: f32[128,128], index: 1, kind: input, shape index: {}]   ;;  %s1406_s2 = inlined_call_operand.hbm [shape: f32[128,128], index: 2, kind: output, shape index: {0}]   ;;  %s1407_s3 = inlined_call_operand.hbm [shape: f32[128,128], index: 3, kind: output, shape index: {1}]   ;;  %s1408_s4 = inlined_call_operand.hbm [shape: f32[1], index: 4, kind: output, shape index: {2}]  }
   0x1   :  { %11 = vsyncpa [#allocation7], 0 }
   0x2   :  { %12 = vsyncpa [#allocation4], 0 }
   0x3   :  { %13 = vsyncpa [#allocation10], 0 }
   0x4   :  { %14 = vsyncpa [#allocation5], 0  ;;  %s797_s15 = smov [#allocation2]   ;;  %s689_s19 = scalar_lea.hbm %s1404_s0, 2048 }
   0x5   :  { %s20_s16 = sshll.u32 %s797_s15, 4  ;;  %p690_p0 = scmp.ne.s32.totalorder %s1404_s0, %s689_s19  ;;  %s21_s16 = int_to_ptr.vmem [resolvable:$true] %s20_s16 }
   0x6   :  { %p693_p1 = scmp.lt.u32.totalorder %s689_s19, %s1404_s0 }
   0x8   :  { %p695_p2 = pnand %p693_p1, %p690_p0 }
   0xa   :  { %698 = shalt.err (!%p695_p2)
}
   0xb   :  { %s699_s24 = scalar_lea.vmem %s21_s16, 2048  ;;  %p704_p4 = scmp.lt.s32.totalorder %s21_s16, %s21_s16 }
   0xc   :  { %p700_p3 = scmp.ne.s32.totalorder %s21_s16, %s699_s24  ;;  %p705_p5 = scmp.lt.s32.totalorder %s699_s24, %s699_s24 }
   0xe   :  { %p706_p6 = por %p705_p5, %p704_p4 }
  0x10   :  { %p707_p7 = pnand %p706_p6, %p700_p3 }
  0x12   :  { %710 = shalt.err (!%p707_p7)
}
  0x13   :  { %s798_s25 = smov 128   ;;  %s799_s26 = smov 8  }
  0x14   :  { %26 = dma.hbm_to_vmem [thread:$0]  %s1404_s0, 2048, %s21_s16, [#allocation3], %s798_s25, %s798_s25, %s799_s26  }
  0x15   :  { %s800_s29 = smov [#allocation6]   ;;  %s711_s7 = scalar_lea.hbm %s1405_s1, 2048 }
  0x16   :  { %s32_s30 = sshll.u32 %s800_s29, 4  ;;  %p712_p8 = scmp.ne.s32.totalorder %s1405_s1, %s711_s7  ;;  %s33_s30 = int_to_ptr.vmem [resolvable:$true] %s32_s30 }
  0x17   :  { %p715_p9 = scmp.lt.u32.totalorder %s711_s7, %s1405_s1 }
  0x19   :  { %p717_p10 = pnand %p715_p9, %p712_p8 }
  0x1b   :  { %720 = shalt.err (!%p717_p10)
}
  0x1c   :  { %s721_s12 = scalar_lea.vmem %s33_s30, 2048  ;;  %p726_p12 = scmp.lt.s32.totalorder %s33_s30, %s33_s30 }
  0x1d   :  { %p722_p11 = scmp.ne.s32.totalorder %s33_s30, %s721_s12  ;;  %p727_p13 = scmp.lt.s32.totalorder %s721_s12, %s721_s12 }
  0x1f   :  { %p728_p0 = por %p727_p13, %p726_p12 }
  0x21   :  { %p729_p1 = pnand %p728_p0, %p722_p11 }
  0x23   :  { %732 = shalt.err (!%p729_p1)
}
  0x24   :  { %38 = dma.hbm_to_vmem [thread:$0]  %s1405_s1, 2048, %s33_s30, [#allocation7], %s798_s25, %s798_s25, %s799_s26  }
  0x25   :  { %787 = dma.done.wait [#allocation3], 2048  }
  0x26   :  { %788 = vsyncadd [#allocation3], 4294965248 }
  0x27   :  { %789 = dma.done.wait [#allocation7], 2048  }
  0x28   :  { %790 = vsyncadd [#allocation7], 4294965248  ;;  %v859_v0 = vld [vmem:[#allocation2] sm:$0xff]  ;;  %v861_v1 = vld [vmem:[#allocation2 + $0x8] sm:$0xff]  ;;  %s801_s1 = smov [#allocation8]   ;;  %s802_s15 = smov [#allocation9]  }
  0x29   :  { %1425 = vst [vmem:[#allocation17_spill] sm:$0xff] %v859_v0  ;;  %1426 = vst [vmem:[#allocation18_spill] sm:$0xff] %v861_v1  ;;  %v863_v2 = vld [vmem:[#allocation2 + $0x10] sm:$0xff]  ;;  %v865_v3 = vld [vmem:[#allocation2 + $0x18] sm:$0xff]  ;;  %s526_s14 = sshll.u32 %s801_s1, 4  ;;  %s538_s16 = sshll.u32 %s802_s15, 4  ;;  %s527_s14 = int_to_ptr.vmem [resolvable:$true] %s526_s14  ;;  %s1355_s16 = int_to_ptr.vmem [resolvable:$true] %s538_s16 }
  0x2a   :  { %1427 = vst [vmem:[#allocation19_spill] sm:$0xff] %v863_v2  ;;  %1428 = vst [vmem:[#allocation20_spill] sm:$0xff] %v865_v3  ;;  %v867_v4 = vld [vmem:[#allocation2 + $0x20] sm:$0xff]  ;;  %v869_v5 = vld [vmem:[#allocation2 + $0x28] sm:$0xff]  ;;  %s733_s17 = scalar_lea.vmem %s527_s14, 2048  ;;  %p738_p3 = scmp.lt.s32.totalorder %s527_s14, %s527_s14 }
  0x2b   :  { %1429 = vst [vmem:[#allocation21_spill] sm:$0xff] %v867_v4  ;;  %1430 = vst [vmem:[#allocation22_spill] sm:$0xff] %v869_v5  ;;  %v874_v6 = vld [vmem:[#allocation2 + $0x30] sm:$0xff]  ;;  %v876_v7 = vld [vmem:[#allocation2 + $0x38] sm:$0xff]  ;;  %p734_p2 = scmp.ne.s32.totalorder %s527_s14, %s733_s17  ;;  %p739_p4 = scmp.lt.s32.totalorder %s733_s17, %s733_s17 }
  0x2c   :  { %333 = vst [vmem:[#allocation8] sm:$0xff] %v859_v0  ;;  %334 = vst [vmem:[#allocation8 + $0x8] sm:$0xff] %v861_v1  ;;  %v878_v8 = vld [vmem:[#allocation2 + $0x40] sm:$0xff]  ;;  %v883_v9 = vld [vmem:[#allocation2 + $0x48] sm:$0xff] }
  0x2d   :  { %335 = vst [vmem:[#allocation8 + $0x10] sm:$0xff] %v863_v2  ;;  %1431 = vst [vmem:[#allocation23_spill] sm:$0xff] %v874_v6  ;;  %v885_v10 = vld [vmem:[#allocation2 + $0x50] sm:$0xff]  ;;  %v887_v11 = vld [vmem:[#allocation2 + $0x58] sm:$0xff]  ;;  %p740_p5 = por %p739_p4, %p738_p3 }
  0x2e   :  { %1432 = vst [vmem:[#allocation24_spill] sm:$0xff] %v876_v7  ;;  %1433 = vst [vmem:[#allocation25_spill] sm:$0xff] %v878_v8  ;;  %v892_v12 = vld [vmem:[#allocation2 + $0x60] sm:$0xff]  ;;  %v894_v13 = vld [vmem:[#allocation2 + $0x68] sm:$0xff] }
  0x2f   :  { %336 = vst [vmem:[#allocation8 + $0x18] sm:$0xff] %v865_v3  ;;  %337 = vst [vmem:[#allocation8 + $0x20] sm:$0xff] %v867_v4  ;;  %v896_v14 = vld [vmem:[#allocation2 + $0x70] sm:$0xff]  ;;  %v901_v15 = vld [vmem:[#allocation2 + $0x78] sm:$0xff]  ;;  %p741_p6 = pnand %p740_p5, %p734_p2 }
  0x30   :  { %338 = vst [vmem:[#allocation8 + $0x28] sm:$0xff] %v869_v5  ;;  %1434 = vst [vmem:[#allocation26_spill] sm:$0xff] %v883_v9  ;;  %v907_v16 = vld [vmem:[#allocation6] sm:$0xff]  ;;  %v909_v17 = vld [vmem:[#allocation6 + $0x8] sm:$0xff] }
  0x31   :  { %1435 = vst [vmem:[#allocation27_spill] sm:$0xff] %v885_v10  ;;  %1436 = vst [vmem:[#allocation28_spill] sm:$0xff] %v887_v11  ;;  %v911_v18 = vld [vmem:[#allocation6 + $0x10] sm:$0xff]  ;;  %v913_v19 = vld [vmem:[#allocation6 + $0x18] sm:$0xff]  ;;  %v93_v23 = vmin.f32 %v907_v16, 20.0  ;;  %v94_v24 = vmin.f32 %v909_v17, 20.0 }
  0x32   :  { %339 = vst [vmem:[#allocation8 + $0x30] sm:$0xff] %v874_v6  ;;  %340 = vst [vmem:[#allocation8 + $0x38] sm:$0xff] %v876_v7  ;;  %v915_v20 = vld [vmem:[#allocation6 + $0x20] sm:$0xff]  ;;  %v917_v21 = vld [vmem:[#allocation6 + $0x28] sm:$0xff]  ;;  %v95_v25 = vmin.f32 %v911_v18, 20.0  ;;  %v96_v26 = vmin.f32 %v913_v19, 20.0 }
  0x33   :  { %341 = vst [vmem:[#allocation8 + $0x40] sm:$0xff] %v878_v8  ;;  %1437 = vst [vmem:[#allocation29_spill] sm:$0xff] %v892_v12  ;;  %v919_v22 = vld [vmem:[#allocation6 + $0x30] sm:$0xff]  ;;  %v925_v27 = vld [vmem:[#allocation6 + $0x38] sm:$0xff]  ;;  %v97_v28 = vmin.f32 %v915_v20, 20.0  ;;  %v98_v31 = vmin.f32 %v917_v21, 20.0 }
  0x34   :  { %1438 = vst [vmem:[#allocation30_spill] sm:$0xff] %v894_v13  ;;  %1439 = vst [vmem:[#allocation31_spill] sm:$0xff] %v896_v14  ;;  %v928_v29 = vld [vmem:[#allocation6 + $0x40] sm:$0xff]  ;;  %v930_v30 = vld [vmem:[#allocation6 + $0x48] sm:$0xff]  ;;  %v99_v32 = vmin.f32 %v919_v22, 20.0  ;;  %v100_v37 = vmin.f32 %v925_v27, 20.0 }
  0x35   :  { %342 = vst [vmem:[#allocation8 + $0x48] sm:$0xff] %v883_v9  ;;  %343 = vst [vmem:[#allocation8 + $0x50] sm:$0xff] %v885_v10  ;;  %v109_v33 = vmul.f32 1.442695, %v93_v23  ;;  %v111_v34 = vmul.f32 1.442695, %v94_v24 }
  0x36   :  { %344 = vst [vmem:[#allocation8 + $0x58] sm:$0xff] %v887_v11  ;;  %1440 = vst [vmem:[#allocation32_spill] sm:$0xff] %v901_v15  ;;  %v113_v35 = vmul.f32 1.442695, %v95_v25  ;;  %v934_v36 = vld [vmem:[#allocation6 + $0x50] sm:$0xff]  ;;  %v937_v39 = vld [vmem:[#allocation6 + $0x58] sm:$0xff] }
  0x37   :  { %345 = vst [vmem:[#allocation8 + $0x60] sm:$0xff] %v892_v12  ;;  %346 = vst [vmem:[#allocation8 + $0x68] sm:$0xff] %v894_v13  ;;  %v115_v38 = vmul.f32 1.442695, %v96_v26  ;;  %v101_v40 = vmin.f32 %v928_v29, 20.0  ;;  %593 = vpow2.f32 %v109_v33  ;;  %v940_v42 = vld [vmem:[#allocation6 + $0x60] sm:$0xff] }
  0x38   :  { %347 = vst [vmem:[#allocation8 + $0x70] sm:$0xff] %v896_v14  ;;  %348 = vst [vmem:[#allocation8 + $0x78] sm:$0xff] %v901_v15  ;;  %v117_v41 = vmul.f32 1.442695, %v97_v28  ;;  %v102_v43 = vmin.f32 %v930_v30, 20.0  ;;  %595 = vpow2.f32 %v111_v34  ;;  %v943_v45 = vld [vmem:[#allocation6 + $0x68] sm:$0xff] }
  0x39   :  { %v119_v44 = vmul.f32 1.442695, %v98_v31  ;;  %v103_v46 = vmin.f32 %v934_v36, 20.0  ;;  %597 = vpow2.f32 %v113_v35  ;;  %v121_v47 = vmul.f32 1.442695, %v99_v32  ;;  %v946_v48 = vld [vmem:[#allocation6 + $0x70] sm:$0xff] }
  0x3a   :  { %v104_v49 = vmin.f32 %v937_v39, 20.0  ;;  %599 = vpow2.f32 %v115_v38  ;;  %v123_v50 = vmul.f32 1.442695, %v100_v37  ;;  %v949_v51 = vld [vmem:[#allocation6 + $0x78] sm:$0xff]  ;;  %v105_v52 = vmin.f32 %v940_v42, 20.0 }
  0x3b   :  { %601 = vpow2.f32 %v117_v41  ;;  %v125_v53 = vmul.f32 1.442695, %v101_v40  ;;  %v106_v54 = vmin.f32 %v943_v45, 20.0  ;;  %v127_v55 = vmul.f32 1.442695, %v102_v43 }
  0x3c   :  { %603 = vpow2.f32 %v119_v44  ;;  %v107_v56 = vmin.f32 %v946_v48, 20.0  ;;  %v129_v57 = vmul.f32 1.442695, %v103_v46  ;;  %v108_v58 = vmin.f32 %v949_v51, 20.0 }
  0x3d   :  { %605 = vpow2.f32 %v121_v47  ;;  %v131_v59 = vmul.f32 1.442695, %v104_v49  ;;  %v133_v60 = vmul.f32 1.442695, %v105_v52  ;;  %v135_v61 = vmul.f32 1.442695, %v106_v54 }
  0x3e   :  { %607 = vpow2.f32 %v123_v50  ;;  %v137_v63 = vmul.f32 1.442695, %v107_v56  ;;  %v139_v24 = vmul.f32 1.442695, %v108_v58  ;;  %vm77_vm10 = vcmp.gt.f32.partialorder %v907_v16, 20.0 }
  0x3f   :  { %609 = vpow2.f32 %v125_v53  ;;  %vm83_vm12 = vcmp.gt.f32.partialorder %v919_v22, 20.0  ;;  %vm88_vm11 = vcmp.gt.f32.partialorder %v937_v39, 20.0 }
  0x40   :  { %611 = vpow2.f32 %v127_v55 }
  0x41   :  { %v594_v62 = vpop.eup %593  ;;  %613 = vpow2.f32 %v129_v57 }
  0x42   :  { %v596_v23 = vpop.eup %595  ;;  %615 = vpow2.f32 %v131_v59  ;;  %v144_v25 = vmul.f32 -0.5, %v594_v62  ;;  %v141_v28 = vadd.f32 1.0, %v594_v62  ;;  %v147_v33 = vand.u32 2147483647, %v594_v62 }
  0x43   :  { %v598_v26 = vpop.eup %597  ;;  %617 = vpow2.f32 %v133_v60  ;;  %v153_v31 = vmul.f32 -0.5, %v596_v23  ;;  %v150_v34 = vadd.f32 1.0, %v596_v23  ;;  %v156_v44 = vand.u32 2147483647, %v596_v23 }
  0x44   :  { %v600_v32 = vpop.eup %599  ;;  %619 = vpow2.f32 %v135_v61  ;;  %v145_v37 = vadd.f32 1.0, %v144_v25  ;;  %v159_v38 = vadd.f32 1.0, %v598_v26  ;;  %v162_v40 = vmul.f32 -0.5, %v598_v26 }
  0x45   :  { %v602_v35 = vpop.eup %601  ;;  %621 = vpow2.f32 %v137_v63  ;;  %v154_v43 = vadd.f32 1.0, %v153_v31  ;;  %v168_v46 = vadd.f32 1.0, %v600_v32  ;;  %v165_v50 = vand.u32 2147483647, %v598_v26 }
  0x46   :  { %v604_v41 = vpop.eup %603  ;;  %623 = vpow2.f32 %v139_v24  ;;  %v163_v49 = vadd.f32 1.0, %v162_v40  ;;  %v171_v52 = vmul.f32 -0.5, %v600_v32  ;;  %v174_v54 = vand.u32 2147483647, %v600_v32 }
  0x47   :  { %v606_v47 = vpop.eup %605  ;;  %625 = vlog2.f32 %v141_v28  ;;  %v177_v55 = vadd.f32 1.0, %v602_v35  ;;  %v959_v57 = vmul.f32 %v594_v62, %v145_v37  ;;  %vm961_vm0 = vcmp.lt.f32.partialorder %v147_v33, 0.0004427343 }
  0x48   :  { %v955_v53 = vpop.eup %607  ;;  %627 = vlog2.f32 %v150_v34  ;;  %v172_v59 = vadd.f32 1.0, %v171_v52  ;;  %v180_v60 = vmul.f32 -0.5, %v602_v35  ;;  %v967_v63 = vmul.f32 %v596_v23, %v154_v43 }
  0x49   :  { %v957_v56 = vpop.eup %609  ;;  %629 = vlog2.f32 %v159_v38  ;;  %v183_v24 = vand.u32 2147483647, %v602_v35  ;;  %v186_v25 = vadd.f32 1.0, %v604_v41  ;;  %vm971_vm1 = vcmp.lt.f32.partialorder %v156_v44, 0.0004427343 }
  0x4a   :  { %v965_v61 = vpop.eup %611  ;;  %631 = vlog2.f32 %v168_v46  ;;  %v975_v62 = vmul.f32 %v598_v26, %v163_v49  ;;  %vm977_vm2 = vcmp.lt.f32.partialorder %v165_v50, 0.0004427343  ;;  %v181_v34 = vadd.f32 1.0, %v180_v60 }
  0x4b   :  { %v969_v28 = vpop.eup %613  ;;  %633 = vlog2.f32 %v177_v55  ;;  %v189_v37 = vmul.f32 -0.5, %v604_v41  ;;  %vm983_vm3 = vcmp.lt.f32.partialorder %v174_v54, 0.0004427343  ;;  %v192_v40 = vand.u32 2147483647, %v604_v41 }
  0x4c   :  { %v981_v23 = vpop.eup %615  ;;  %635 = vlog2.f32 %v186_v25  ;;  %v195_v43 = vadd.f32 1.0, %v606_v47  ;;  %v989_v26 = vmul.f32 %v600_v32, %v172_v59  ;;  %v198_v49 = vmul.f32 -0.5, %v606_v47 }
  0x4d   :  { %v987_v44 = vpop.eup %617  ;;  %v190_v46 = vadd.f32 1.0, %v189_v37  ;;  %v201_v50 = vand.u32 2147483647, %v606_v47  ;;  %vm993_vm4 = vcmp.lt.f32.partialorder %v183_v24, 0.0004427343  ;;  %v204_v54 = vadd.f32 1.0, %v955_v53 }
  0x4e   :  { %v991_v52 = vpop.eup %619  ;;  %637 = vlog2.f32 %v195_v43  ;;  %v207_v60 = vmul.f32 -0.5, %v955_v53  ;;  %v1001_v15 = vmul.f32 %v602_v35, %v181_v34  ;;  %vm1003_vm5 = vcmp.lt.f32.partialorder %v192_v40, 0.0004427343 }
  0x4f   :  { %v999_v25 = vpop.eup %621  ;;  %v199_v59 = vadd.f32 1.0, %v198_v49  ;;  %v210_v37 = vand.u32 2147483647, %v955_v53  ;;  %639 = vlog2.f32 %v204_v54  ;;  %v213_v43 = vadd.f32 1.0, %v957_v56 }
  0x50   :  { %v1008_v24 = vpop.eup %623  ;;  %v208_v14 = vadd.f32 1.0, %v207_v60  ;;  %v216_v13 = vmul.f32 -0.5, %v957_v56  ;;  %v1012_v11 = vmul.f32 %v604_v41, %v190_v46  ;;  %vm1014_vm6 = vcmp.lt.f32.partialorder %v201_v50, 0.0004427343 }
  0x51   :  { %v626_v12 = vpop.eup %625  ;;  %v219_v34 = vand.u32 2147483647, %v957_v56  ;;  %v222_v40 = vadd.f32 1.0, %v965_v61  ;;  %v1022_v54 = vmul.f32 %v606_v47, %v199_v59  ;;  %641 = vlog2.f32 %v213_v43 }
  0x52   :  { %v628_v49 = vpop.eup %627  ;;  %v1020_v10 = vmul.f32 0.6931472, %v626_v12  ;;  %v217_v60 = vadd.f32 1.0, %v216_v13  ;;  %vm1026_vm7 = vcmp.lt.f32.partialorder %v210_v37, 0.0004427343  ;;  %v225_v46 = vmul.f32 -0.5, %v965_v61 }
  0x53   :  { %v630_v9 = vpop.eup %629  ;;  %v1024_v8 = vmul.f32 0.6931472, %v628_v49  ;;  %643 = vlog2.f32 %v222_v40  ;;  %v1038_v13 = vmul.f32 %v955_v53, %v208_v14  ;;  %v228_v59 = vand.u32 2147483647, %v965_v61 }
  0x54   :  { %v632_v50 = vpop.eup %631  ;;  %v1035_v47 = vmul.f32 0.6931472, %v630_v9  ;;  %v1044_v40 = vmul.f32 %v957_v56, %v217_v60  ;;  %vm1046_vm8 = vcmp.lt.f32.partialorder %v219_v34, 0.0004427343  ;;  %v226_v7 = vadd.f32 1.0, %v225_v46 }
  0x55   :  { %v634_v37 = vpop.eup %633  ;;  %v1041_v43 = vmul.f32 0.6931472, %v632_v50  ;;  %v231_v12 = vadd.f32 1.0, %v969_v28  ;;  %v234_v34 = vmul.f32 -0.5, %v969_v28  ;;  %vm1068_vm9 = vcmp.lt.f32.partialorder %v228_v59, 0.0004427343 }
  0x56   :  { %v636_v9 = vpop.eup %635  ;;  %v1059_v56 = vmul.f32 0.6931472, %v634_v37  ;;  %v1075_v37 = vmul.f32 %v965_v61, %v226_v7  ;;  %v237_v6 = vand.u32 2147483647, %v969_v28  ;;  %v240_v60 = vadd.f32 1.0, %v981_v23 }
  0x57   :  { %v1066_v46 = vmul.f32 0.6931472, %v636_v9  ;;  %645 = vlog2.f32 %v231_v12  ;;  %v235_v53 = vadd.f32 1.0, %v234_v34  ;;  %v243_v9 = vmul.f32 -0.5, %v981_v23 }
  0x58   :  { %v638_v14 = vpop.eup %637  ;;  %v246_v5 = vand.u32 2147483647, %v981_v23  ;;  %647 = vlog2.f32 %v240_v60  ;;  %vm1105_vm14 = vcmp.lt.f32.partialorder %v237_v6, 0.0004427343  ;;  %v252_v60 = vmul.f32 -0.5, %v987_v44 }
  0x59   :  { %v1084_v59 = vmul.f32 0.6931472, %v638_v14  ;;  %v640_v7 = vpop.eup %639  ;;  %v1095_v34 = vmul.f32 %v969_v28, %v235_v53  ;;  %v249_v14 = vadd.f32 1.0, %v987_v44  ;;  %v244_v28 = vadd.f32 1.0, %v243_v9 }
  0x5a   :  { %v206_v4 = vmul.f32 0.6931472, %v640_v7  ;;  %v255_v3 = vand.u32 2147483647, %v987_v44  ;;  %v258_v2 = vadd.f32 1.0, %v991_v52  ;;  %v261_v9 = vmul.f32 -0.5, %v991_v52 }
  0x5b   :  { %v203_v12 = vsel %vm1014_vm6, %v1022_v54, %v1084_v59  ;;  %v642_v53 = vpop.eup %641  ;;  %649 = vlog2.f32 %v249_v14  ;;  %vm1119_vm13 = vcmp.lt.f32.partialorder %v246_v5, 0.0004427343  ;;  %v245_v14 = vmul.f32 %v981_v23, %v244_v28 }
  0x5c   :  { %v212_v6 = vsel %vm1026_vm7, %v1038_v13, %v206_v4  ;;  %v215_v54 = vmul.f32 0.6931472, %v642_v53  ;;  %v253_v1 = vadd.f32 1.0, %v252_v60  ;;  %651 = vlog2.f32 %v258_v2 }
  0x5d   :  { %v644_v35 = vpop.eup %643  ;;  %vm1126_vm15 = vcmp.lt.f32.partialorder %v255_v3, 0.0004427343  ;;  %v262_v41 = vadd.f32 1.0, %v261_v9  ;;  %v264_v4 = vand.u32 2147483647, %v991_v52  ;;  %v267_v5 = vadd.f32 1.0, %v999_v25 }
  0x5e   :  { %v224_v7 = vmul.f32 0.6931472, %v644_v35  ;;  %v221_v13 = vsel %vm1046_vm8, %v1044_v40, %v215_v54  ;;  %v270_v2 = vmul.f32 -0.5, %v999_v25  ;;  %v273_v3 = vand.u32 2147483647, %v999_v25 }
  0x5f   :  { %v254_v53 = vmul.f32 %v987_v44, %v253_v1  ;;  %v263_v60 = vmul.f32 %v991_v52, %v262_v41  ;;  %653 = vlog2.f32 %v267_v5  ;;  %v276_v35 = vadd.f32 1.0, %v1008_v24 }
  0x60   :  { %v230_v23 = vsel %vm1068_vm9, %v1075_v37, %v224_v7  ;;  %vm1144_vm8 = vcmp.lt.f32.partialorder %v264_v4, 0.0004427343  ;;  %v271_v50 = vadd.f32 1.0, %v270_v2  ;;  %v279_v37 = vmul.f32 -0.5, %v1008_v24 }
  0x61   :  { %v646_v28 = vpop.eup %645  ;;  %vm1149_vm9 = vcmp.lt.f32.partialorder %v273_v3, 0.0004427343  ;;  %655 = vlog2.f32 %v276_v35  ;;  %v282_v1 = vand.u32 2147483647, %v1008_v24  ;;  %v1471_v44 = vsel %vm961_vm0, %v959_v57, %v1020_v10 }
  0x62   :  { %v233_v49 = vmul.f32 0.6931472, %v646_v28  ;;  %v285_v52 = vsel %vm77_vm10, %v907_v16, %v1471_v44  ;;  %v1472_v9 = vsel %vm971_vm1, %v967_v63, %v1024_v8  ;;  %vm1473_vm7 = vcmp.gt.f32.partialorder %v909_v17, 20.0  ;;  %v648_v41 = vpop.eup %647  ;;  %v1490_v63 = vld [vmem:[#allocation17_spill] sm:$0xff] }
  0x63   :  { %v286_v7 = vsel %vm1473_vm7, %v909_v17, %v1472_v9  ;;  %vm91_vm6 = vcmp.gt.f32.partialorder %v946_v48, 20.0  ;;  %v272_v57 = vmul.f32 %v999_v25, %v271_v50  ;;  %v280_v58 = vadd.f32 1.0, %v279_v37 }
  0x64   :  { %v239_v10 = vsel %vm1105_vm14, %v1095_v34, %v233_v49  ;;  %v1474_v16 = vsel %vm977_vm2, %v975_v62, %v1035_v47  ;;  %vm1475_vm0 = vcmp.gt.f32.partialorder %v911_v18, 20.0  ;;  %v242_v17 = vmul.f32 0.6931472, %v648_v41 }
  0x65   :  { %v287_v8 = vsel %vm1475_vm0, %v911_v18, %v1474_v16  ;;  %vm1183_vm1 = vcmp.lt.f32.partialorder %v282_v1, 0.0004427343  ;;  %v1478_v31 = vsel %vm983_vm3, %v989_v26, %v1041_v43  ;;  %vm1479_vm10 = vcmp.gt.f32.partialorder %v913_v19, 20.0  ;;  %v650_v25 = vpop.eup %649 }
  0x66   :  { %v288_v33 = vsel %vm1479_vm10, %v913_v19, %v1478_v31  ;;  %v1480_v62 = vsel %vm993_vm4, %v1001_v15, %v1059_v56  ;;  %vm1481_vm2 = vcmp.gt.f32.partialorder %v915_v20, 20.0  ;;  %vm92_vm14 = vcmp.gt.f32.partialorder %v949_v51, 20.0  ;;  %v652_v32 = vpop.eup %651 }
  0x67   :  { %v289_v18 = vsel %vm1481_vm2, %v915_v20, %v1480_v62  ;;  %v281_v38 = vmul.f32 %v1008_v24, %v280_v58  ;;  %v1482_v26 = vsel %vm1003_vm5, %v1012_v11, %v1066_v46  ;;  %vm1483_vm3 = vcmp.gt.f32.partialorder %v917_v21, 20.0 }
  0x68   :  { %v290_v19 = vsel %vm1483_vm3, %v917_v21, %v1482_v26  ;;  %v291_v15 = vsel %vm83_vm12, %v919_v22, %v203_v12  ;;  %vm1484_vm4 = vcmp.gt.f32.partialorder %v925_v27, 20.0  ;;  %v248_v55 = vsel %vm1119_vm13, %v245_v14, %v242_v17 }
  0x69   :  { %v292_v20 = vsel %vm1484_vm4, %v925_v27, %v212_v6  ;;  %v251_v24 = vmul.f32 0.6931472, %v650_v25  ;;  %vm1485_vm7 = vcmp.gt.f32.partialorder %v928_v29, 20.0  ;;  %vm1486_vm5 = vcmp.gt.f32.partialorder %v930_v30, 20.0 }
  0x6a   :  { %v293_v11 = vsel %vm1485_vm7, %v928_v29, %v221_v13  ;;  %v294_v21 = vsel %vm1486_vm5, %v930_v30, %v230_v23  ;;  %vm1487_vm12 = vcmp.gt.f32.partialorder %v934_v36, 20.0  ;;  %v296_v27 = vsel %vm88_vm11, %v937_v39, %v248_v55 }
  0x6b   :  { %v295_v22 = vsel %vm1487_vm12, %v934_v36, %v239_v10  ;;  %v301_v47 = vadd.f32 1e-06, %v285_v52  ;;  %v302_v43 = vadd.f32 1e-06, %v286_v7  ;;  %v257_v56 = vsel %vm1126_vm15, %v254_v53, %v251_v24  ;;  %v654_v36 = vpop.eup %653 }
  0x6c   :  { %v260_v46 = vmul.f32 0.6931472, %v652_v32  ;;  %v303_v29 = vadd.f32 1e-06, %v287_v8  ;;  %v304_v12 = vadd.f32 1e-06, %v288_v33  ;;  %v656_v2 = vpop.eup %655  ;;  %v429_v31 = vmul.f32 %v1490_v63, %v1490_v63 }
  0x6d   :  { %vm1488_vm13 = vcmp.gt.f32.partialorder %v940_v42, 20.0  ;;  %v305_v61 = vadd.f32 1e-06, %v289_v18  ;;  %v306_v34 = vadd.f32 1e-06, %v290_v19  ;;  %vm1489_vm11 = vcmp.gt.f32.partialorder %v943_v45, 20.0 }
  0x6e   :  { %v297_v30 = vsel %vm1488_vm13, %v940_v42, %v257_v56  ;;  %v307_v6 = vadd.f32 1e-06, %v291_v15  ;;  %v266_v59 = vsel %vm1144_vm8, %v263_v60, %v260_v46  ;;  %v308_v39 = vadd.f32 1e-06, %v292_v20  ;;  %v1491_v33 = vld [vmem:[#allocation18_spill] sm:$0xff]  ;;  %v1492_v19 = vld [vmem:[#allocation19_spill] sm:$0xff] }
  0x6f   :  { %v309_v14 = vadd.f32 1e-06, %v293_v11  ;;  %v310_v4 = vadd.f32 1e-06, %v294_v21  ;;  %v269_v5 = vmul.f32 0.6931472, %v654_v36  ;;  %v298_v0 = vsel %vm1489_vm11, %v943_v45, %v266_v59 }
  0x70   :  { %v311_v13 = vadd.f32 1e-06, %v295_v22  ;;  %v312_v23 = vadd.f32 1e-06, %v296_v27  ;;  %v313_v3 = vadd.f32 1e-06, %v297_v30  ;;  %v317_v28 = vmul.f32 %v301_v47, %v301_v47 }
  0x71   :  { %v314_v42 = vadd.f32 1e-06, %v298_v0  ;;  %v318_v53 = vmul.f32 %v302_v43, %v302_v43  ;;  %v275_v35 = vsel %vm1149_vm9, %v272_v57, %v269_v5  ;;  %v278_v49 = vmul.f32 0.6931472, %v656_v2  ;;  %v1493_v21 = vld [vmem:[#allocation20_spill] sm:$0xff]  ;;  %v1494_v46 = vld [vmem:[#allocation21_spill] sm:$0xff] }
  0x72   :  { %v1245_v60 = vmul.f32 %v303_v29, %v303_v29  ;;  %v1247_v40 = vmul.f32 %v304_v12, %v304_v12  ;;  %v299_v50 = vsel %vm91_vm6, %v946_v48, %v275_v35  ;;  %v1252_v45 = vmul.f32 %v305_v61, %v305_v61  ;;  %349 = vst [vmem:[#allocation9] sm:$0xff] %v317_v28  ;;  %v1496_v2 = vld [vmem:[#allocation23_spill] sm:$0xff] }
  0x73   :  { %v1254_v37 = vmul.f32 %v306_v34, %v306_v34  ;;  %v1256_v1 = vmul.f32 %v307_v6, %v307_v6  ;;  %350 = vst [vmem:[#allocation9 + $0x8] sm:$0xff] %v318_v53  ;;  %v284_v54 = vsel %vm1183_vm1, %v281_v38, %v278_v49  ;;  %v315_v44 = vadd.f32 1e-06, %v299_v50  ;;  %v1495_v34 = vld [vmem:[#allocation22_spill] sm:$0xff] }
  0x74   :  { %v1260_v52 = vmul.f32 %v308_v39, %v308_v39  ;;  %v1262_v9 = vmul.f32 %v309_v14, %v309_v14  ;;  %351 = vst [vmem:[#allocation9 + $0x10] sm:$0xff] %v1245_v60  ;;  %352 = vst [vmem:[#allocation9 + $0x18] sm:$0xff] %v1247_v40  ;;  %v300_v48 = vsel %vm92_vm14, %v949_v51, %v284_v54  ;;  %657 = vlog2.f32 %v317_v28 }
  0x75   :  { %v1269_v7 = vmul.f32 %v310_v4, %v310_v4  ;;  %v1271_v41 = vmul.f32 %v311_v13, %v311_v13  ;;  %v1273_v10 = vmul.f32 %v312_v23, %v312_v23  ;;  %353 = vst [vmem:[#allocation9 + $0x20] sm:$0xff] %v1252_v45  ;;  %354 = vst [vmem:[#allocation9 + $0x28] sm:$0xff] %v1254_v37  ;;  %v316_v57 = vadd.f32 1e-06, %v300_v48 }
  0x76   :  { %355 = vst [vmem:[#allocation9 + $0x30] sm:$0xff] %v1256_v1  ;;  %v1278_v58 = vmul.f32 %v313_v3, %v313_v3  ;;  %v1280_v16 = vmul.f32 %v314_v42, %v314_v42  ;;  %v1282_v8 = vmul.f32 %v315_v44, %v315_v44  ;;  %356 = vst [vmem:[#allocation9 + $0x38] sm:$0xff] %v1260_v52  ;;  %659 = vlog2.f32 %v318_v53  ;;  %v1497_v42 = vld [vmem:[#allocation24_spill] sm:$0xff] }
  0x77   :  { %357 = vst [vmem:[#allocation9 + $0x40] sm:$0xff] %v1262_v9  ;;  %358 = vst [vmem:[#allocation9 + $0x48] sm:$0xff] %v1269_v7  ;;  %v1289_v51 = vmul.f32 %v316_v57, %v316_v57  ;;  %661 = vlog2.f32 %v1245_v60  ;;  %v430_v62 = vmul.f32 %v1491_v33, %v1491_v33  ;;  %v431_v15 = vmul.f32 %v1492_v19, %v1492_v19 }
  0x78   :  { %359 = vst [vmem:[#allocation9 + $0x50] sm:$0xff] %v1271_v41  ;;  %360 = vst [vmem:[#allocation9 + $0x58] sm:$0xff] %v1273_v10  ;;  %663 = vlog2.f32 %v1247_v40  ;;  %v432_v32 = vmul.f32 %v1493_v21, %v1493_v21  ;;  %v445_v22 = vadd.f32 %v429_v31, %v317_v28  ;;  %v433_v29 = vmul.f32 %v1494_v46, %v1494_v46 }
  0x79   :  { %361 = vst [vmem:[#allocation9 + $0x60] sm:$0xff] %v1278_v58  ;;  %362 = vst [vmem:[#allocation9 + $0x68] sm:$0xff] %v1280_v16  ;;  %665 = vlog2.f32 %v1252_v45  ;;  %v446_v27 = vadd.f32 %v430_v62, %v318_v53  ;;  %v447_v12 = vadd.f32 %v431_v15, %v1245_v60  ;;  %v434_v6 = vmul.f32 %v1495_v34, %v1495_v34 }
  0x7a   :  { %363 = vst [vmem:[#allocation9 + $0x70] sm:$0xff] %v1282_v8  ;;  %364 = vst [vmem:[#allocation9 + $0x78] sm:$0xff] %v1289_v51  ;;  %667 = vlog2.f32 %v1254_v37  ;;  %v448_v39 = vadd.f32 %v432_v32, %v1247_v40  ;;  %v461_v14 = vmul.f32 100.0, %v445_v22  ;;  %v435_v3 = vmul.f32 %v1496_v2, %v1496_v2 }
  0x7b   :  { %669 = vlog2.f32 %v1256_v1  ;;  %v462_v4 = vmul.f32 100.0, %v446_v27  ;;  %v436_v28 = vmul.f32 %v1497_v42, %v1497_v42  ;;  %v449_v53 = vadd.f32 %v433_v29, %v1252_v45  ;;  %v1498_v45 = vld [vmem:[#allocation25_spill] sm:$0xff] }
  0x7c   :  { %671 = vlog2.f32 %v1260_v52  ;;  %v463_v35 = vmul.f32 100.0, %v447_v12  ;;  %v450_v54 = vadd.f32 %v434_v6, %v1254_v37  ;;  %v464_v44 = vmul.f32 100.0, %v448_v39  ;;  %v1502_v42 = vld [vmem:[#allocation29_spill] sm:$0xff] }
  0x7d   :  { %673 = vlog2.f32 %v1262_v9  ;;  %v437_v62 = vmul.f32 %v1498_v45, %v1498_v45 }
  0x7e   :  { %v658_v17 = vpop.eup %657  ;;  %675 = vlog2.f32 %v1269_v7  ;;  %v466_v21 = vmul.f32 100.0, %v450_v54 }
  0x7f   :  { %v366_v25 = vmul.f32 0.6931472, %v658_v17  ;;  %677 = vlog2.f32 %v1271_v41  ;;  %v453_v29 = vadd.f32 %v437_v62, %v1262_v9 }
  0x80   :  { %v660_v18 = vpop.eup %659  ;;  %679 = vlog2.f32 %v1273_v10 }
  0x81   :  { %v662_v38 = vpop.eup %661  ;;  %v368_v26 = vmul.f32 0.6931472, %v660_v18  ;;  %v397_v11 = vsub.f32 -4.6051702, %v366_v25  ;;  %681 = vlog2.f32 %v1278_v58  ;;  %v451_v18 = vadd.f32 %v435_v3, %v1256_v1  ;;  %v1500_v1 = vld [vmem:[#allocation27_spill] sm:$0xff] }
  0x82   :  { %v664_v20 = vpop.eup %663  ;;  %v370_v55 = vmul.f32 0.6931472, %v662_v38  ;;  %683 = vlog2.f32 %v1280_v16  ;;  %v465_v25 = vmul.f32 100.0, %v449_v53  ;;  %v439_v46 = vmul.f32 %v1500_v1, %v1500_v1 }
  0x83   :  { %v666_v24 = vpop.eup %665  ;;  %v372_v47 = vmul.f32 0.6931472, %v664_v20  ;;  %v398_v43 = vsub.f32 -4.6051702, %v368_v26  ;;  %v568_v59 = vadd.f32 -1.0, %v397_v11  ;;  %685 = vlog2.f32 %v1282_v8 }
  0x84   :  { %v668_v56 = vpop.eup %667  ;;  %v374_v30 = vmul.f32 0.6931472, %v666_v24  ;;  %v399_v61 = vsub.f32 -4.6051702, %v370_v55  ;;  %687 = vlog2.f32 %v1289_v51  ;;  %v1499_v55 = vld [vmem:[#allocation26_spill] sm:$0xff]  ;;  %v452_v11 = vadd.f32 %v436_v28, %v1260_v52  ;;  %v1501_v52 = vld [vmem:[#allocation28_spill] sm:$0xff] }
  0x85   :  { %v670_v36 = vpop.eup %669  ;;  %v376_v5 = vmul.f32 0.6931472, %v668_v56  ;;  %v400_v0 = vsub.f32 -4.6051702, %v372_v47  ;;  %v569_v13 = vadd.f32 -1.0, %v398_v43  ;;  %v477_v48 = vadd.f32 %v568_v59, %v461_v14 }
  0x86   :  { %v672_v23 = vpop.eup %671  ;;  %v378_v49 = vmul.f32 0.6931472, %v670_v36  ;;  %v401_v60 = vsub.f32 -4.6051702, %v374_v30  ;;  %v570_v40 = vadd.f32 -1.0, %v399_v61  ;;  %v438_v24 = vmul.f32 %v1499_v55, %v1499_v55  ;;  %v1505_v55 = vld [vmem:[#allocation32_spill] sm:$0xff] }
  0x87   :  { %v674_v50 = vpop.eup %673  ;;  %v380_v17 = vmul.f32 0.6931472, %v672_v23  ;;  %v402_v63 = vsub.f32 -4.6051702, %v376_v5  ;;  %v571_v31 = vadd.f32 -1.0, %v400_v0  ;;  %v478_v33 = vadd.f32 %v569_v13, %v462_v4 }
  0x88   :  { %v676_v57 = vpop.eup %675  ;;  %v382_v26 = vmul.f32 0.6931472, %v674_v50  ;;  %v403_v19 = vsub.f32 -4.6051702, %v378_v49  ;;  %v572_v15 = vadd.f32 -1.0, %v401_v60  ;;  %v479_v37 = vadd.f32 %v570_v40, %v463_v35 }
  0x89   :  { %v678_v38 = vpop.eup %677  ;;  %v384_v20 = vmul.f32 0.6931472, %v676_v57  ;;  %v404_v22 = vsub.f32 -4.6051702, %v380_v17  ;;  %v573_v27 = vadd.f32 -1.0, %v402_v63  ;;  %v480_v47 = vadd.f32 %v571_v31, %v464_v44  ;;  %v1503_v44 = vld [vmem:[#allocation30_spill] sm:$0xff] }
  0x8a   :  { %v680_v32 = vpop.eup %679  ;;  %v493_v43 = vadd.f32 %v478_v33, %v477_v48  ;;  %v386_v56 = vmul.f32 0.6931472, %v678_v38  ;;  %v467_v12 = vmul.f32 100.0, %v451_v18  ;;  %v405_v61 = vsub.f32 -4.6051702, %v382_v26  ;;  %v1504_v18 = vld [vmem:[#allocation31_spill] sm:$0xff] }
  0x8b   :  { %v682_v30 = vpop.eup %681  ;;  %v574_v34 = vadd.f32 -1.0, %v403_v19  ;;  %v481_v6 = vadd.f32 %v572_v15, %v465_v25  ;;  %v388_v59 = vmul.f32 0.6931472, %v680_v32  ;;  %v440_v39 = vmul.f32 %v1501_v52, %v1501_v52 }
  0x8c   :  { %v494_v36 = vadd.f32 %v493_v43, %v479_v37  ;;  %v454_v14 = vadd.f32 %v438_v24, %v1269_v7  ;;  %v468_v4 = vmul.f32 100.0, %v452_v11  ;;  %v684_v5 = vpop.eup %683  ;;  %v406_v0 = vsub.f32 -4.6051702, %v384_v20 }
  0x8d   :  { %v575_v13 = vadd.f32 -1.0, %v404_v22  ;;  %v482_v23 = vadd.f32 %v573_v27, %v466_v21  ;;  %v686_v3 = vpop.eup %685  ;;  %v390_v9 = vmul.f32 0.6931472, %v682_v30  ;;  %v441_v28 = vmul.f32 %v1502_v42, %v1502_v42 }
  0x8e   :  { %v495_v2 = vadd.f32 %v494_v36, %v480_v47  ;;  %v455_v53 = vadd.f32 %v439_v46, %v1271_v41  ;;  %v469_v35 = vmul.f32 100.0, %v453_v29  ;;  %v407_v49 = vsub.f32 -4.6051702, %v386_v56  ;;  %v688_v54 = vpop.eup %687 }
  0x8f   :  { %v576_v60 = vadd.f32 -1.0, %v405_v61  ;;  %v483_v40 = vadd.f32 %v574_v34, %v467_v12  ;;  %v392_v7 = vmul.f32 0.6931472, %v684_v5  ;;  %v442_v48 = vmul.f32 %v1503_v44, %v1503_v44 }
  0x90   :  { %v496_v50 = vadd.f32 %v495_v2, %v481_v6  ;;  %v456_v57 = vadd.f32 %v440_v39, %v1273_v10  ;;  %v470_v17 = vmul.f32 100.0, %v454_v14  ;;  %v408_v63 = vsub.f32 -4.6051702, %v388_v59 }
  0x91   :  { %v577_v31 = vadd.f32 -1.0, %v406_v0  ;;  %v484_v33 = vadd.f32 %v575_v13, %v468_v4  ;;  %v394_v62 = vmul.f32 0.6931472, %v686_v3  ;;  %v443_v41 = vmul.f32 %v1504_v18, %v1504_v18 }
  0x92   :  { %v497_v45 = vadd.f32 %v496_v50, %v482_v23  ;;  %v457_v25 = vadd.f32 %v441_v28, %v1278_v58  ;;  %v471_v38 = vmul.f32 100.0, %v455_v53  ;;  %v409_v26 = vsub.f32 -4.6051702, %v390_v9 }
  0x93   :  { %v578_v19 = vadd.f32 -1.0, %v407_v49  ;;  %v485_v15 = vadd.f32 %v576_v60, %v469_v35  ;;  %v396_v20 = vmul.f32 0.6931472, %v688_v54  ;;  %v444_v10 = vmul.f32 %v1505_v55, %v1505_v55 }
  0x94   :  { %v498_v37 = vadd.f32 %v497_v45, %v483_v40  ;;  %v458_v24 = vadd.f32 %v442_v48, %v1280_v16  ;;  %v472_v11 = vmul.f32 100.0, %v456_v57  ;;  %v410_v21 = vsub.f32 -4.6051702, %v392_v7 }
  0x95   :  { %v579_v32 = vadd.f32 -1.0, %v408_v63  ;;  %v486_v22 = vadd.f32 %v577_v31, %v470_v17  ;;  %v459_v47 = vadd.f32 %v443_v41, %v1282_v8  ;;  %v473_v43 = vmul.f32 100.0, %v457_v25 }
  0x96   :  { %v499_v27 = vadd.f32 %v498_v37, %v484_v33  ;;  %v411_v58 = vsub.f32 -4.6051702, %v394_v62  ;;  %v580_v56 = vadd.f32 -1.0, %v409_v26  ;;  %v487_v1 = vadd.f32 %v578_v19, %v471_v38 }
  0x97   :  { %v460_v29 = vadd.f32 %v444_v10, %v1289_v51  ;;  %v474_v12 = vmul.f32 100.0, %v458_v24  ;;  %v412_v30 = vsub.f32 -4.6051702, %v396_v20  ;;  %v581_v61 = vadd.f32 -1.0, %v410_v21 }
  0x98   :  { %v500_v46 = vadd.f32 %v499_v27, %v485_v15  ;;  %v488_v34 = vadd.f32 %v579_v32, %v472_v11  ;;  %v582_v16 = vadd.f32 -1.0, %v411_v58  ;;  %v475_v36 = vmul.f32 100.0, %v459_v47 }
  0x99   :  { %v489_v59 = vadd.f32 %v580_v56, %v473_v43  ;;  %v583_v39 = vadd.f32 -1.0, %v412_v30  ;;  %v476_v14 = vmul.f32 100.0, %v460_v29  ;;  %v490_v4 = vadd.f32 %v581_v61, %v474_v12 }
  0x9a   :  { %v501_v6 = vadd.f32 %v500_v46, %v486_v22  ;;  %v491_v5 = vadd.f32 %v582_v16, %v475_v36 }
  0x9b   :  { %v492_v13 = vadd.f32 %v583_v39, %v476_v14 }
  0x9c   :  { %v502_v52 = vadd.f32 %v501_v6, %v487_v1 }
  0x9e   :  { %v503_v8 = vadd.f32 %v502_v52, %v488_v34 }
  0xa0   :  { %v504_v0 = vadd.f32 %v503_v8, %v489_v59 }
  0xa2   :  { %v505_v23 = vadd.f32 %v504_v0, %v490_v4 }
  0xa4   :  { %v506_v2 = vadd.f32 %v505_v23, %v491_v5 }
  0xa6   :  { %v507_v3 = vadd.f32 %v506_v2, %v492_v13 }
  0xa8   :  { %508 = vadd.xlane.f32.xlu0 %v507_v3 }
  0xa9   :  { %744 = shalt.err (!%p741_p6)
}
  0xaa   :  { %s745_s20 = scalar_lea.hbm %s1406_s2, 2048 }
  0xab   :  { %p746_p7 = scmp.ne.s32.totalorder %s1406_s2, %s745_s20  ;;  %p749_p8 = scmp.lt.u32.totalorder %s745_s20, %s1406_s2 }
  0xad   :  { %p751_p9 = pnand %p749_p8, %p746_p7 }
  0xaf   :  { %754 = shalt.err (!%p751_p9)
}
  0xb0   :  { %532 = dma.vmem_to_hbm [thread:$0]  %s527_s14, 2048, %s1406_s2, [#allocation4], %s798_s25, %s798_s25, %s799_s26  }
  0xb1   :  { %s755_s29 = scalar_lea.vmem %s1355_s16, 2048  ;;  %p760_p11 = scmp.lt.s32.totalorder %s1355_s16, %s1355_s16 }
  0xb2   :  { %p756_p10 = scmp.ne.s32.totalorder %s1355_s16, %s755_s29  ;;  %p761_p12 = scmp.lt.s32.totalorder %s755_s29, %s755_s29 }
  0xb4   :  { %p762_p13 = por %p761_p12, %p760_p11 }
  0xb6   :  { %p763_p0 = pnand %p762_p13, %p756_p10 }
  0xb8   :  { %766 = shalt.err (!%p763_p0)
}
  0xb9   :  { %s767_s6 = scalar_lea.hbm %s1407_s3, 2048 }
  0xba   :  { %p768_p1 = scmp.ne.s32.totalorder %s1407_s3, %s767_s6  ;;  %p771_p2 = scmp.lt.u32.totalorder %s767_s6, %s1407_s3 }
  0xbc   :  { %p773_p3 = pnand %p771_p2, %p768_p1 }
  0xbe   :  { %776 = shalt.err (!%p773_p3)
}
  0xbf   :  { %544 = dma.vmem_to_hbm [thread:$0]  %s1355_s16, 2048, %s1407_s3, [#allocation10], %s798_s25, %s798_s25, %s799_s26  }
  0xc0   :  { %s777_s14 = scalar_lea.hbm %s1408_s4, 16 }
  0xc1   :  { %p778_p4 = scmp.ne.s32.totalorder %s1408_s4, %s777_s14  ;;  %p781_p5 = scmp.lt.u32.totalorder %s777_s14, %s1408_s4 }
  0xc3   :  { %p783_p6 = pnand %p781_p5, %p778_p4 }
 0x135   :  { %v509_v51 = vpop.xlane.xlu0 %508 }
 0x136   :  { %v510_v9 = vrot.slane %v509_v51, 4 }
 0x138   :  { %v511_v42 = vadd.f32 %v510_v9, %v509_v51 }
 0x13a   :  { %v512_v28 = vrot.slane %v511_v42, 2 }
 0x13c   :  { %v513_v53 = vadd.f32 %v512_v28, %v511_v42 }
 0x13e   :  { %v514_v35 = vrot.slane %v513_v53, 1 }
 0x140   :  { %v515_v49 = vadd.f32 %v514_v35, %v513_v53 }
 0x142   :  { %584 = vpush %v515_v49 }
 0x173   :  { %s585_s12 = spop %584 }
 0x174   :  { %s517_s0 = smul.f32 0.5, %s585_s12 }
 0x176   :  { %520 = sst [smem:[#allocation11]] %s517_s0 }
 0x177   :  { %786 = shalt.err (!%p783_p6)
}
 0x178   :  { %s803_s26 = smov [#allocation11]  }
 0x179   :  { %552 = dma.smem_to_hbm %s803_s26, 16, %s1408_s4, [#allocation5]  }
 0x17a   :  { %791 = dma.done.wait [#allocation4], 2048  }
 0x17b   :  { %792 = vsyncadd [#allocation4], 4294965248 }
 0x17c   :  { %793 = dma.done.wait [#allocation10], 2048  }
 0x17d   :  { %794 = vsyncadd [#allocation10], 4294965248 }
 0x17e   :  { %795 = dma.done.wait [#allocation5], 16  }
 0x17f   :  { %796 = vsyncadd [#allocation5], 4294967280 }
 0x180   :  { %562 = sfence }
 0x181   :  { %563 = vsyncpa [#allocation3], 1 }
 0x182   :  { %564 = vsyncpa [#allocation7], 1 }
 0x183   :  { %565 = vsyncpa [#allocation4], 1 }
 0x184   :  { %566 = vsyncpa [#allocation10], 1 }
 0x185   :  { %567 = vsyncpa [#allocation5], 1 }

</bundles_post_ra>
